<compile_context>
chip_gen: v5e
topology: v5e:2x2
jax: 0.10.0
libtpu: 0.0.40
codegen_flags: <defaults>
</compile_context>

<pallas_src>
import functools

import jax
import jax.numpy as jnp
import numpy as np
from jax.experimental import pallas as pl
from jax.experimental.pallas import tpu as pltpu


def _round_up(x, m):
    return (x + m - 1) // m * m


def _cdiv(a, b):
    return -(-a // b)


def _pick_vmem_limit_bytes():
    # Generation-aware VMEM budget (128 MiB physical on v5e/v6e, 64 MiB on v7x).
    try:
        cap = int(pltpu.get_tpu_info().vmem_capacity_bytes)
    except Exception:
        return 32 * 1024 * 1024
    return int(min(cap * 3 // 4, 96 * 1024 * 1024))


def _span_extractor_kernel(meta_ref, logits_ref, seq_ref, out_ref, p_ref):
    """One (batch row, span tile, D tile) grid step.

    meta_ref   : (1, NT, 8) int32   lanes: 0 = start, 1 = end (inclusive), 2 = row mask
    logits_ref : (1, 1, S)  float32 precomputed global attention logits
    seq_ref    : (1, S, DT) f32/bf16 sequence slab
    out_ref    : (1, NT, DT) float32
    p_ref      : (NT, S) VMEM scratch, attention weights for the current span tile
    """
    nt, seq_len = p_ref.shape

    @pl.when(pl.program_id(2) == 0)
    def _():
        meta = meta_ref[0]                                    # (NT, 8) int32
        starts = meta[:, 0:1]                                 # (NT, 1)
        ends = meta[:, 1:2]
        row_ok = meta[:, 2:3]
        logits = logits_ref[0]                                # (1, S) f32

        # Per-span membership mask over the sequence axis (same positions as
        # batched_span_select); span_indices_mask folded in so masked / padded
        # rows produce exactly-zero attention weights.
        col = jax.lax.broadcasted_iota(jnp.int32, (nt, seq_len), 1)
        valid = jnp.logical_and(jnp.logical_and(col >= starts, col <= ends),
                                row_ok > 0)
        maskf = valid.astype(jnp.float32)

        # Fused AllenNLP masked_softmax (memory_efficient=False):
        #   softmax(logits*mask) -> *mask -> /(sum + 1e-13)
        # == (e*mask) / (sum(e*mask) + 1e-13 * sum(e)),  e = exp(logits*mask - max)
        masked_logits = logits * maskf                        # (NT, S)
        m = jnp.max(masked_logits, axis=-1, keepdims=True)
        e = jnp.exp(masked_logits - m)
        num = e * maskf
        denom = (jnp.sum(num, axis=-1, keepdims=True)
                 + 1e-13 * jnp.sum(e, axis=-1, keepdims=True))
        p_ref[...] = (num / denom).astype(p_ref.dtype)

    # weighted_sum over the span == a single lane/sublane-dense MXU matmul.
    out_ref[0] = jnp.dot(p_ref[...], seq_ref[0],
                         preferred_element_type=jnp.float32).astype(out_ref.dtype)


def self_attentive_span_extractor(sequence_tensor, span_indices, weight, bias,
                                  span_indices_mask=None, *, span_tile=None,
                                  d_tile=512, use_bf16_matmul=True):
    """Forward pass of SelfAttentiveSpanExtractor.  Fully static shapes (jit-able).

    sequence_tensor : (B, S, D) float
    span_indices    : (B, N, 2) int, inclusive [start, end]
    weight, bias    : Linear(D, 1) parameters, shapes (1, D) / (1,)
    span_indices_mask : optional (B, N)
    Returns (B, N, D) float32.
    """
    seq_f32 = sequence_tensor.astype(jnp.float32)
    B, S, D = seq_f32.shape
    N = span_indices.shape[1]

    # --- global attention logits, precomputed lane-dense in the wrapper ------
    w = weight.reshape(D).astype(jnp.float32)
    b = bias.reshape(()).astype(jnp.float32)
    logits = (jnp.einsum('bsd,d->bs', seq_f32, w) + b)[:, None, :]   # (B, 1, S)

    # --- balanced span tiling (multiple of 8 sublanes, dense output stores) --
    if span_tile is None:
        # v6e/v7x MXU is 2x256^2 -> feed the full array when enough spans exist.
        span_tile = 256 if N >= 256 else 128
    n_tiles = _cdiv(max(N, 1), span_tile)
    nt = _round_up(_cdiv(max(N, 1), n_tiles), 8)
    Np = nt * n_tiles
    pad = Np - N

    # --- pack starts / ends / row-mask into a single int32 block -------------
    starts = span_indices[..., 0].astype(jnp.int32)
    ends = span_indices[..., 1].astype(jnp.int32)
    if span_indices_mask is None:
        rowmask = jnp.ones((B, N), jnp.int32)
    else:
        rowmask = (span_indices_mask != 0).astype(jnp.int32)
    meta = jnp.stack([starts, ends, rowmask], axis=-1)        # (B, N, 3)
    # Padded spans get rowmask == 0 -> exactly-zero attention weights.
    meta = jnp.pad(meta, ((0, 0), (0, pad), (0, 5)))          # (B, Np, 8)

    # --- sequence tensor in the matmul dtype (bf16 halves the dominant DMA) --
    compute_dtype = jnp.bfloat16 if use_bf16_matmul else jnp.float32
    seq_in = seq_f32.astype(compute_dtype)

    # --- optional D tiling (keeps large S*D inside v7x's 64 MiB VMEM) --------
    if d_tile is None or d_tile >= D:
        dt = D
    else:
        dt = _round_up(min(d_tile, D), 128)
        if dt >= D or D % dt != 0:
            dt = D                                            # full-extent fallback

    grid = (B, Np // nt, D // dt)
    span_sem = "arbitrary" if B >= 2 else "parallel"

    out = pl.pallas_call(
        _span_extractor_kernel,
        out_shape=jax.ShapeDtypeStruct((B, Np, D), jnp.float32),
        grid=grid,
        in_specs=[
            pl.BlockSpec((1, nt, 8), lambda bb, nn, dd: (bb, nn, 0)),   # span meta
            pl.BlockSpec((1, 1, S), lambda bb, nn, dd: (bb, 0, 0)),     # logits
            pl.BlockSpec((1, S, dt), lambda bb, nn, dd: (bb, 0, dd)),   # sequence
        ],
        out_specs=pl.BlockSpec((1, nt, dt), lambda bb, nn, dd: (bb, nn, dd)),
        scratch_shapes=[pltpu.VMEM((nt, S), compute_dtype)],
        compiler_params=pltpu.CompilerParams(
            dimension_semantics=("parallel", span_sem, "arbitrary"),
            vmem_limit_bytes=_pick_vmem_limit_bytes()),
    )(meta, logits, seq_in)

    return out[:, :N, :]


def _reference(sequence_tensor, span_indices, weight, bias,
               span_indices_mask=None):
    """Pure-JAX mirror of the PyTorch module, for verification (eager only)."""
    seq = sequence_tensor.astype(jnp.float32)
    B, S, D = seq.shape
    logits = seq @ weight.reshape(D, 1).astype(jnp.float32) + bias.astype(jnp.float32)
    cat = jnp.concatenate([seq, logits], axis=-1)                   # (B, S, D+1)

    starts = span_indices[..., 0:1]
    ends = span_indices[..., 1:2]
    widths = ends - starts
    W = int(jnp.max(widths)) + 1
    rng = jnp.arange(W).reshape(1, 1, W)
    mask = (rng <= widths).astype(jnp.float32)
    raw = ends - rng
    mask = mask * (raw >= 0).astype(jnp.float32)
    idx = jnp.maximum(raw, 0)                                       # (B, N, W)

    gathered = jnp.take_along_axis(cat[:, None, :, :],
                                   idx[..., None].astype(jnp.int32), axis=2)
    span_emb = gathered[..., :D]
    span_logits = gathered[..., D]

    p = jax.nn.softmax(span_logits * mask, axis=-1)
    p = p * mask
    p = p / (jnp.sum(p, axis=-1, keepdims=True) + 1e-13)
    out = jnp.sum(p[..., None] * span_emb, axis=2)
    if span_indices_mask is not None:
        out = out * span_indices_mask[..., None].astype(jnp.float32)
    return out


if __name__ == "__main__":
    B, S, D, N = 2, 128, 128, 6

    key = jax.random.PRNGKey(0)
    k_seq, k_w, k_b = jax.random.split(key, 3)

    sequence_tensor = jax.random.normal(k_seq, (B, S, D), dtype=jnp.float32)
    # Linear(D, 1): weight shape (1, D), bias shape (1,)
    weight = jax.random.normal(k_w, (1, D), dtype=jnp.float32) * 0.1
    bias = jax.random.normal(k_b, (1,), dtype=jnp.float32) * 0.1

    span_indices = jnp.array(
        [[[0, 3], [10, 10], [5, 40], [100, 127], [64, 64], [20, 33]],
         [[1, 4], [0, 0], [7, 9], [50, 90], [127, 127], [30, 30]]],
        dtype=jnp.int32)
    span_indices_mask = jnp.array([[1, 1, 1, 0, 1, 1],
                                   [1, 0, 1, 1, 1, 1]], dtype=jnp.int32)

    ref = _reference(sequence_tensor, span_indices, weight, bias,
                     span_indices_mask)

    # Exact-parity f32 path (tight tolerance).
    extract_f32 = jax.jit(functools.partial(self_attentive_span_extractor,
                                            use_bf16_matmul=False))
    out_f32 = jax.block_until_ready(
        extract_f32(sequence_tensor, span_indices, weight, bias,
                    span_indices_mask))
    np.testing.assert_allclose(np.asarray(out_f32), np.asarray(ref),
                               rtol=1e-5, atol=1e-5)

    # Default fast path: bf16 sequence DMA + bf16 MXU inputs, f32 accumulation.
    extract = jax.jit(self_attentive_span_extractor)
    out = jax.block_until_ready(
        extract(sequence_tensor, span_indices, weight, bias,
                span_indices_mask))
    np.testing.assert_allclose(np.asarray(out), np.asarray(ref),
                               rtol=3e-2, atol=3e-2)

    print("KERNEL_OK")
</pallas_src>

<mosaic_0001>
module attributes {stable_mosaic.version = 11 : i64} {
  func.func @_span_extractor_kernel(%arg0: i32, %arg1: i32, %arg2: i32, %arg3: memref<1x8x8xi32, #tpu.memory_space<vmem>>, %arg4: memref<1x1x128xf32, #tpu.memory_space<vmem>>, %arg5: memref<1x128x128xf32, #tpu.memory_space<vmem>>, %arg6: memref<1x8x128xf32, #tpu.memory_space<vmem>>, %arg7: memref<8x128xf32, #tpu.memory_space<vmem>>) attributes {dimension_semantics = [#tpu.dimension_semantics<parallel>, #tpu.dimension_semantics<arbitrary>, #tpu.dimension_semantics<arbitrary>], iteration_bounds = array<i64: 2, 1, 1>, scalar_prefetch = 0 : i64, scratch_operands = 1 : i64, tpu.core_type = #tpu.core_type<tc>, window_params = [{transform_indices = @transform_0, window_bounds = array<i64: 1, 8, 8>}, {transform_indices = @transform_1, window_bounds = array<i64: 1, 1, 128>}, {transform_indices = @transform_2, window_bounds = array<i64: 1, 128, 128>}, {transform_indices = @transform_3, window_bounds = array<i64: 1, 8, 128>}]} {
    %c0_i32 = arith.constant 0 : i32
    %0 = arith.cmpi eq, %arg2, %c0_i32 : i32
    %1 = arith.extui %0 : i1 to i32
    %c0_i32_0 = arith.constant 0 : i32
    %2 = arith.cmpi ne, %1, %c0_i32_0 : i32
    scf.if %2 {
      %c0_8 = arith.constant 0 : index
      %c0_9 = arith.constant 0 : index
      %c0_10 = arith.constant 0 : index
      %10 = vector.load %arg3[%c0_8, %c0_9, %c0_10] : memref<1x8x8xi32, #tpu.memory_space<vmem>>, vector<1x8x8xi32>
      %11 = vector.shape_cast %10 : vector<1x8x8xi32> to vector<8x8xi32>
      %12 = vector.extract_strided_slice %11 {offsets = [0, 0], sizes = [8, 1], strides = [1, 1]} : vector<8x8xi32> to vector<8x1xi32>
      %13 = vector.extract_strided_slice %11 {offsets = [0, 1], sizes = [8, 1], strides = [1, 1]} : vector<8x8xi32> to vector<8x1xi32>
      %14 = vector.extract_strided_slice %11 {offsets = [0, 2], sizes = [8, 1], strides = [1, 1]} : vector<8x8xi32> to vector<8x1xi32>
      %c0_11 = arith.constant 0 : index
      %c0_12 = arith.constant 0 : index
      %c0_13 = arith.constant 0 : index
      %15 = vector.load %arg4[%c0_11, %c0_12, %c0_13] : memref<1x1x128xf32, #tpu.memory_space<vmem>>, vector<1x1x128xf32>
      %16 = vector.shape_cast %15 : vector<1x1x128xf32> to vector<1x128xf32>
      %17 = tpu.iota {dimensions = array<i32: 1>} : vector<8x128xi32>
      %18 = vector.broadcast %12 : vector<8x1xi32> to vector<8x128xi32>
      %19 = arith.cmpi sge, %17, %18 : vector<8x128xi32>
      %20 = vector.broadcast %13 : vector<8x1xi32> to vector<8x128xi32>
      %21 = arith.cmpi sle, %17, %20 : vector<8x128xi32>
      %22 = arith.andi %19, %21 : vector<8x128xi1>
      %c0_i32_14 = arith.constant 0 : i32
      %23 = vector.broadcast %c0_i32_14 : i32 to vector<8x1xi32>
      %24 = arith.cmpi sgt, %14, %23 : vector<8x1xi32>
      %25 = vector.broadcast %24 : vector<8x1xi1> to vector<8x128xi1>
      %26 = arith.andi %22, %25 : vector<8x128xi1>
      %27 = arith.extui %26 : vector<8x128xi1> to vector<8x128xi32>
      %28 = arith.sitofp %27 : vector<8x128xi32> to vector<8x128xf32>
      %29 = vector.broadcast %16 : vector<1x128xf32> to vector<8x128xf32>
      %30 = arith.mulf %29, %28 : vector<8x128xf32>
      %cst_15 = arith.constant dense<0xFF800000> : vector<8xf32>
      %31 = vector.multi_reduction <maximumf>, %30, %cst_15 [1] : vector<8x128xf32> to vector<8xf32>
      %32 = vector.shape_cast %31 : vector<8xf32> to vector<8x1xf32>
      %33 = vector.broadcast %32 : vector<8x1xf32> to vector<8x128xf32>
      %34 = arith.subf %30, %33 : vector<8x128xf32>
      %35 = math.exp %34 : vector<8x128xf32>
      %36 = arith.mulf %35, %28 : vector<8x128xf32>
      %cst_16 = arith.constant dense<0.000000e+00> : vector<8xf32>
      %37 = vector.multi_reduction <add>, %36, %cst_16 [1] : vector<8x128xf32> to vector<8xf32>
      %38 = vector.shape_cast %37 : vector<8xf32> to vector<8x1xf32>
      %cst_17 = arith.constant dense<0.000000e+00> : vector<8xf32>
      %39 = vector.multi_reduction <add>, %35, %cst_17 [1] : vector<8x128xf32> to vector<8xf32>
      %40 = vector.shape_cast %39 : vector<8xf32> to vector<8x1xf32>
      %cst_18 = arith.constant 9.99999982E-14 : f32
      %41 = vector.broadcast %cst_18 : f32 to vector<8x1xf32>
      %42 = arith.mulf %41, %40 : vector<8x1xf32>
      %43 = arith.addf %38, %42 : vector<8x1xf32>
      %44 = vector.broadcast %43 : vector<8x1xf32> to vector<8x128xf32>
      %45 = arith.divf %36, %44 : vector<8x128xf32>
      %c0_19 = arith.constant 0 : index
      %c0_20 = arith.constant 0 : index
      %46 = vector.load %arg7[%c0_19, %c0_20] : memref<8x128xf32, #tpu.memory_space<vmem>>, vector<8x128xf32>
      tpu.vector_store %arg7[%c0_19, %c0_20], %45 {strides = array<i32>} : memref<8x128xf32, #tpu.memory_space<vmem>>, vector<8x128xf32>,
    } else {
    }
    %c0 = arith.constant 0 : index
    %c0_1 = arith.constant 0 : index
    %3 = vector.load %arg7[%c0, %c0_1] : memref<8x128xf32, #tpu.memory_space<vmem>>, vector<8x128xf32>
    %c0_2 = arith.constant 0 : index
    %c0_3 = arith.constant 0 : index
    %c0_4 = arith.constant 0 : index
    %4 = vector.load %arg5[%c0_2, %c0_3, %c0_4] : memref<1x128x128xf32, #tpu.memory_space<vmem>>, vector<1x128x128xf32>
    %5 = vector.shape_cast %4 : vector<1x128x128xf32> to vector<128x128xf32>
    %cst = arith.constant dense<0.000000e+00> : vector<8x128xf32>
    %6 = tpu.matmul %3, %5, %cst {dimension_numbers = #tpu.dot_dimension_numbers<[1], [0], [0], [1], [0, 0, 1, 1], [], []>} : vector<8x128xf32>, vector<128x128xf32>, vector<8x128xf32> -> vector<8x128xf32>
    %c0_5 = arith.constant 0 : index
    %c0_6 = arith.constant 0 : index
    %c0_7 = arith.constant 0 : index
    %7 = vector.load %arg6[%c0_5, %c0_6, %c0_7] : memref<1x8x128xf32, #tpu.memory_space<vmem>>, vector<1x8x128xf32>
    %8 = vector.shape_cast %7 : vector<1x8x128xf32> to vector<8x128xf32>
    %9 = vector.shape_cast %6 : vector<8x128xf32> to vector<1x8x128xf32>
    tpu.vector_store %arg6[%c0_5, %c0_6, %c0_7], %9 {strides = array<i32>} : memref<1x8x128xf32, #tpu.memory_space<vmem>>, vector<1x8x128xf32>,
    return
  }
  func.func @transform_0(%arg0: i32, %arg1: i32, %arg2: i32) -> (i32, i32, i32) {
    %c0_i32 = arith.constant 0 : i32
    %c0_i32_0 = arith.constant 0 : i32
    return %arg0, %arg1, %c0_i32 : i32, i32, i32
  }
  func.func @transform_1(%arg0: i32, %arg1: i32, %arg2: i32) -> (i32, i32, i32) {
    %c0_i32 = arith.constant 0 : i32
    %c0_i32_0 = arith.constant 0 : i32
    %c0_i32_1 = arith.constant 0 : i32
    return %arg0, %c0_i32, %c0_i32_0 : i32, i32, i32
  }
  func.func @transform_2(%arg0: i32, %arg1: i32, %arg2: i32) -> (i32, i32, i32) {
    %c0_i32 = arith.constant 0 : i32
    %c0_i32_0 = arith.constant 0 : i32
    return %arg0, %c0_i32, %arg2 : i32, i32, i32
  }
  func.func @transform_3(%arg0: i32, %arg1: i32, %arg2: i32) -> (i32, i32, i32) {
    %c0_i32 = arith.constant 0 : i32
    return %arg0, %arg1, %arg2 : i32, i32, i32
  }
}

</mosaic_0001>

<bundles_post_ra>
// kernel: self_attentive_span_extractor.1
= control target key start
LH: loop header
LB: loop body
LE: loop exit
PB: predicated region body
PF: predicated region fallthrough
CT: control target
= control target key end

     0   :  { %s565_s12 = smov 0   ;;  %s567_s13 = smov 0   ;;  %s631_s0 = inlined_call_operand.vmem [shape: s32[2,8,8], index: 0, kind: input, shape index: {}]   ;;  %s632_s1 = inlined_call_operand.vmem [shape: f32[2,1,128], index: 1, kind: input, shape index: {}]   ;;  %s633_s2 = inlined_call_operand.vmem [shape: f32[2,128,128], index: 2, kind: input, shape index: {}]   ;;  %s634_s3 = inlined_call_operand.vmem [shape: f32[2,8,128], index: 3, kind: output, shape index: {}]  }
   0x1   :  { %s569_s14 = smov 0  }
   0x2 LB: > { %s32_s15 = sadd.s32 1, %s535_s13  ;;  %p471_p0 = scmp.ge.s32.totalorder %s539_s14, 1  ;;  %s539_s14 = sphi %s569_s14, %s13_s14   ;;  %s535_s13 = sphi %s567_s13, %s636_s13   ;;  %s531_s12 = sphi %s565_s12, %s635_s12  }
   0x3   : > { %p34_p1 = scmp.ge.s32.totalorder %s32_s15, 2  ;;  %p187_p2 = scmp.lt.s32.totalorder %s539_s14, 3 }
   0x5   : > { %s638_s15 = smov (%p34_p1, %s32_s15), 0  ;;  %p188_p3 = pnand %p471_p0, %p187_p2 }
   0x6   : > { %p229_p4 = scmp.lt.s32.totalorder (!%p188_p3), %s531_s12, 1 }
   0x7   : > { %191 = sbr.rel (%p188_p3) target bundleno = 545 (0x221), region = 32 }
   0xc   : > { %v541_v0 = vmov 0   ;;  %v542_v1 = vmov 2   ;;  %s640_s12 = smov (!%p229_p4, %s531_s12), 1  ;;  %v543_v4 = vmov 1   ;;  %v263_v6 = vlaneseq }
   0xd   : > { %508 = vset.pattern.permute.xlu0 %v541_v0  ;;  %510 = vset.pattern.permute.xlu1 %v542_v1  ;;  %s472_s16 = sshll.u32 %s640_s12, 3  ;;  %s238_s22 = scalar_lea.vmem %s632_s1, %s640_s12  ;;  %v544_v11 = vmov 0.0  }
   0xe   : > { %s235_s19 = scalar_lea.vmem %s631_s0, %s472_s16  ;;  %v264_v7 = vand.u32 127, %v263_v6  ;;  %v512_v10 = vld [vmem:[%s238_s22] ss:$0 sm:$0xff]  ;;  %s479_s23 = sshll.u32 %s640_s12, 7 }
   0xf   : > { %v261_v2 = vld [vmem:[%s235_s19] sm:$0xff]  ;;  %s599_s26 = scalar_lea.vmem %s633_s2, %s479_s23  ;;  %s256_s29 = scalar_lea.vmem %s634_s3, %s472_s16 }
  0x10   : > { %266 = vperm.xlu0 %508, %v261_v2   ;;  %vm274_vm0 = vcmp.gt.s32.totalorder %v261_v2, 0  ;;  %v331_v14 = vld [vmem:[%s599_s26 + $0x78] sm:$0xff]  ;;  %v330_v20 = vld [vmem:[%s599_s26 + $0x70] sm:$0xff]  ;;  %v329_v21 = vld [vmem:[%s599_s26 + $0x68] sm:$0xff] }
  0x11   : > { %v275_v3 = vsel %vm274_vm0, 1, %v541_v0  ;;  %332 = vmatpush.msra.mxu0 %v331_v14  ;;  %v328_v22 = vld [vmem:[%s599_s26 + $0x60] sm:$0xff]  ;;  %v327_v23 = vld [vmem:[%s599_s26 + $0x58] sm:$0xff]  ;;  %v326_v24 = vld [vmem:[%s599_s26 + $0x50] sm:$0xff] }
  0x12   : > { %277 = vperm.xlu1 %510, %v275_v3   ;;  %v325_v25 = vld [vmem:[%s599_s26 + $0x48] sm:$0xff]  ;;  %v324_v26 = vld [vmem:[%s599_s26 + $0x40] sm:$0xff]  ;;  %v323_v27 = vld [vmem:[%s599_s26 + $0x38] sm:$0xff] }
  0x13   : > { %333 = vmatpush.msra.mxu0 %v330_v20  ;;  %v322_v28 = vld [vmem:[%s599_s26 + $0x30] sm:$0xff]  ;;  %v321_v29 = vld [vmem:[%s599_s26 + $0x28] sm:$0xff]  ;;  %v320_v30 = vld [vmem:[%s599_s26 + $0x20] sm:$0xff] }
  0x14   : > { %v319_v31 = vld [vmem:[%s599_s26 + $0x18] sm:$0xff]  ;;  %v318_v32 = vld [vmem:[%s599_s26 + $0x10] sm:$0xff]  ;;  %v317_v33 = vld [vmem:[%s599_s26 + $0x8] sm:$0xff] }
  0x15   : > { %334 = vmatpush.msra.mxu0 %v329_v21  ;;  %v316_v34 = vld [vmem:[%s599_s26] sm:$0xff] }
  0x17   : > { %335 = vmatpush.msra.mxu0 %v328_v22 }
  0x18   : > { %509 = vset.pattern.permute.xlu0 %v543_v4 }
  0x19   : > { %270 = vperm.xlu0 %509, %v261_v2   ;;  %336 = vmatpush.msra.mxu0 %v327_v23 }
  0x1b   : > { %337 = vmatpush.msra.mxu0 %v326_v24 }
  0x1d   : > { %338 = vmatpush.msra.mxu0 %v325_v25 }
  0x1f   : > { %339 = vmatpush.msra.mxu0 %v324_v26 }
  0x21   : > { %511 = vset.pattern.permute.xlu0 %v542_v1  ;;  %340 = vmatpush.msra.mxu0 %v323_v27 }
  0x23   : > { %341 = vmatpush.msra.mxu0 %v322_v28 }
  0x25   : > { %342 = vmatpush.msra.mxu0 %v321_v29 }
  0x27   : > { %343 = vmatpush.msra.mxu0 %v320_v30 }
  0x29   : > { %344 = vmatpush.msra.mxu0 %v319_v31 }
  0x2b   : > { %345 = vmatpush.msra.mxu0 %v318_v32 }
  0x2d   : > { %346 = vmatpush.msra.mxu0 %v317_v33 }
  0x2f   : > { %347 = vmatpush.msra.mxu0 %v316_v34 }
  0x82   : > { %v267_v5 = vpop.permute.xlu0 %266 }
  0x83   : > { %vm268_vm2 = vcmp.ge.s32.totalorder %v264_v7, %v267_v5 }
  0x84   : > { %v278_v8 = vpop.permute.xlu1 %277 }
  0x85   : > { %vm279_vm1 = vcmp.eq.s32.totalorder %v278_v8, 1 }
  0x8b   : > { %v271_v9 = vpop.permute.xlu0 %270 }
  0x8c   : > { %vm272_vm3 = vcmp.le.s32.totalorder %v264_v7, %v271_v9 }
  0x8d   : > { %vm273_vm4 = vmand %vm268_vm2, %vm272_vm3 }
  0x8e   : > { %vm280_vm5 = vmand %vm273_vm4, %vm279_vm1 }
  0x8f   : > { %v476_v12 = vsel %vm280_vm5, 1.0, %v544_v11 }
  0x90   : > { %v286_v13 = vmul.f32 %v512_v10, %v476_v12 }
  0x92   : > { %287 = vmax.xlane.f32.xlu1 %v286_v13 }
 0x105   : > { %v288_v15 = vpop.xlane.xlu1 %287 }
 0x106   : > { %v289_v16 = vsub.f32 %v286_v13, %v288_v15 }
 0x108   : > { %v290_v17 = vmul.f32 1.442695, %v289_v16 }
 0x10a   : > { %513 = vpow2.f32 %v290_v17 }
 0x110   : > { %v514_v18 = vpop.eup %513 }
 0x111   : > { %295 = vadd.xlane.f32.xlu2 %v514_v18  ;;  %v292_v19 = vmul.f32 %v514_v18, %v476_v12 }
 0x119   : > { %293 = vadd.xlane.f32.xlu2 %v292_v19 }
 0x184   : > { %v296_v35 = vpop.xlane.xlu2 %295 }
 0x185   : > { %v297_v36 = vmul.f32 1e-13, %v296_v35 }
 0x18c   : > { %v294_v37 = vpop.xlane.xlu2 %293 }
 0x18d   : > { %v298_v38 = vadd.f32 %v297_v36, %v294_v37 }
 0x18f   : > { %515 = vrcp.f32 %v298_v38  ;;  %v310_v42 = vand.u32 2147483648, %v298_v38  ;;  %v308_v44 = vand.u32 2147483647, %v298_v38  ;;  %vm304_vm7 = vweird.f32 %v298_v38 }
 0x191   : > { %v311_v46 = vor.u32 1.1754944e-38, %v310_v42  ;;  %vm309_vm9 = vcmp.eq.f32.partialorder %v308_v44, 8.507059e+37 }
 0x195   : > { %v516_v39 = vpop.eup %515 }
 0x196   : > { %v300_v40 = vmul.f32 %v516_v39, %v298_v38  ;;  %vm305_vm6 = vweird.f32 %v516_v39 }
 0x197   : > { %vm306_vm8 = vmor %vm304_vm7, %vm305_vm6 }
 0x198   : > { %v301_v41 = vsub.f32 1.0, %v300_v40 }
 0x19a   : > { %v302_v43 = vmul.f32 %v516_v39, %v301_v41 }
 0x19c   : > { %v303_v45 = vadd.f32 %v516_v39, %v302_v43 }
 0x19e   : > { %v307_v47 = vsel %vm306_vm8, %v516_v39, %v303_v45 }
 0x19f   : > { %v312_v48 = vsel %vm309_vm9, %v311_v46, %v307_v47 }
 0x1a0   : > { %v313_v49 = vmul.f32 %v312_v48, %v292_v19 }
 0x1a2   : > { %348 = vmatmul.f32.vlgmr.msra.gmra.mxu0 %v313_v49 }
 0x21f   : > { %v349_v50 = vpop.f32.mrf.mxu0 }
 0x220   : > { %352 = vst [vmem:[%s256_s29] sm:$0xff] %v349_v50 }
 0x221 PF: > { %s13_s14 = sadd.s32 1, %s539_s14   ;;  %s635_s12 = smov %s535_s13 }
 0x222   : > { %p10_p5 = scmp.ge.s32.totalorder %s13_s14, 4   ;;  %s636_s13 = smov %s638_s15 }
 0x224   :  { %12 = sbr.rel (!%p10_p5) target bundleno = 2 (0x2), region = 72 }

</bundles_post_ra>
